<compile_context>
chip_gen: v7x
topology: tpu7x:2x2x1
jax: 0.10.0
libtpu: 0.0.40
codegen_flags: <defaults>
</compile_context>

<pallas_src>
import jax
import jax.numpy as jnp
from jax.experimental import pallas as pl
from jax.experimental.pallas import tpu as pltpu


def _make_kernel(H, W):
    HW = H * W

    def kernel(w_ref, ids_ref, x_ref, o_ref):
        # w_ref:   (18,) f32 in SMEM   (flattened (2,3,3) conv weight)
        # ids_ref: (2, HW) int32       (row ids, col ids)
        # x_ref:   (NB, C, HW)         batch-tile of activations
        # o_ref:   (NB, 1, HW)
        C = x_ref.shape[1]

        # ---- channel reduction (mean + max over C), streamed per channel ----
        x0 = x_ref[:, 0, :].astype(jnp.float32)          # (NB, HW)
        s = x0
        m = x0
        for c in range(1, C):
            xc = x_ref[:, c, :].astype(jnp.float32)
            s = s + xc
            m = jnp.maximum(m, xc)
        avg = s * jnp.float32(1.0 / C)                   # == mean over channels

        # ---- hoisted separable boundary masks, shape (1, HW) ----
        row = ids_ref[pl.ds(0, 1), :]
        col = ids_ref[pl.ds(1, 1), :]
        row_ok = {-1: row >= 1, 1: row <= H - 2}
        col_ok = {-1: col >= 1, 1: col <= W - 2}

        # ---- 3x3 SAME conv as shifted MACs; center tap first (no roll/mask).
        acc = w_ref[4] * avg + w_ref[13] * m             # w[0,1,1], w[1,1,1]

        for ky in range(3):
            dy = ky - 1
            for kx in range(3):
                dx = kx - 1
                if dy == 0 and dx == 0:
                    continue
                # shifted[p] = img[p + dy*W + dx]  (wrap-around masked below)
                shift = (-(dy * W + dx)) % HW
                a_sh = pltpu.roll(avg, shift=shift, axis=1)
                m_sh = pltpu.roll(m, shift=shift, axis=1)
                term = (w_ref[ky * 3 + kx] * a_sh
                        + w_ref[9 + ky * 3 + kx] * m_sh)
                if dy != 0 and dx != 0:
                    valid = row_ok[dy] & col_ok[dx]
                elif dy != 0:
                    valid = row_ok[dy]
                else:
                    valid = col_ok[dx]
                acc = acc + jnp.where(valid, term, 0.0)

        o_ref[:, 0, :] = jax.nn.sigmoid(acc).astype(o_ref.dtype)

    return kernel


def spatial_attention(x, w, *, max_block_bytes=2 * 1024 * 1024):
    """x: (N, C, H, W), w: (2, 3, 3) -> sigmoid(conv3x3([mean_c, max_c])), (N,1,H,W)."""
    N, C, H, W = x.shape
    HW = H * W
    itemsize = jnp.dtype(x.dtype).itemsize

    # Lane-dense flattening (free reshape: merges trailing dims).
    x_flat = x.reshape(N, C, HW)
    w_flat = w.reshape(-1).astype(jnp.float32)            # (18,)

    # Precomputed row/col indices for the boundary masks (computed once, in XLA).
    pos = jnp.arange(HW, dtype=jnp.int32)
    ids = jnp.stack([pos // W, pos % W], axis=0)           # (2, HW) int32

    # Batch several images per grid step: largest divisor of N whose input
    # block stays under max_block_bytes (keeps double-buffered VMEM modest on
    # v5e/v6e/v7x while amortizing per-step pipeline overhead).
    per_image = C * HW * itemsize
    nb_cap = max(1, max_block_bytes // per_image)
    NB = 1
    for d in range(1, N + 1):
        if N % d == 0 and d <= nb_cap:
            NB = d
    grid = (N // NB,)

    cost = pl.CostEstimate(
        flops=int(N * HW * (2 * C + 6 * 9)),
        transcendentals=int(N * HW),
        bytes_accessed=int(N * C * HW * itemsize + N * HW * itemsize),
    )

    out_flat = pl.pallas_call(
        _make_kernel(H, W),
        out_shape=jax.ShapeDtypeStruct((N, 1, HW), x.dtype),
        grid=grid,
        in_specs=[
            pl.BlockSpec(memory_space=pltpu.MemorySpace.SMEM),       # weights
            pl.BlockSpec((2, HW), lambda n: (0, 0)),                 # ids (constant block)
            pl.BlockSpec((NB, C, HW), lambda n: (n, 0, 0)),          # x tile
        ],
        out_specs=pl.BlockSpec((NB, 1, HW), lambda n: (n, 0, 0)),
        compiler_params=pltpu.CompilerParams(
            dimension_semantics=("parallel",)),
        cost_estimate=cost,
    )(w_flat, ids, x_flat)

    return out_flat.reshape(N, 1, H, W)


def reference(x, w):
    avg = jnp.mean(x, axis=1, keepdims=True)
    mx = jnp.max(x, axis=1, keepdims=True)
    cat = jnp.concatenate([avg, mx], axis=1)
    out = jax.lax.conv_general_dilated(
        cat, w.reshape(1, 2, 3, 3), window_strides=(1, 1), padding="SAME",
        dimension_numbers=("NCHW", "OIHW", "NCHW"))
    return jax.nn.sigmoid(out)


if __name__ == "__main__":
    key = jax.random.PRNGKey(0)
    kx, kw = jax.random.split(key)

    N, C, H, W = 2, 4, 16, 16
    x = jax.random.normal(kx, (N, C, H, W), dtype=jnp.float32)

    # Conv2d(2, 1, 3, padding=1, bias=False): weight (1, 2, 3, 3) -> stored as (2, 3, 3).
    fan_in = 2 * 3 * 3
    bound = 1.0 / jnp.sqrt(jnp.float32(fan_in))
    w = jax.random.uniform(kw, (2, 3, 3), dtype=jnp.float32,
                           minval=-bound, maxval=bound)

    out = spatial_attention(x, w)
    jax.block_until_ready(out)

    ref = reference(x, w)
    assert out.shape == (N, 1, H, W)
    assert jnp.allclose(out, ref, atol=1e-5, rtol=1e-5)

    print("KERNEL_OK")
</pallas_src>

<mosaic_0001>
module attributes {stable_mosaic.version = 11 : i64} {
  func.func @kernel(%arg0: i32, %arg1: memref<18xf32, #tpu.memory_space<smem>>, %arg2: memref<2x256xi32, #tpu.memory_space<vmem>>, %arg3: memref<2x4x256xf32, #tpu.memory_space<vmem>>, %arg4: memref<2x1x256xf32, #tpu.memory_space<vmem>>) attributes {dimension_semantics = [#tpu.dimension_semantics<parallel>], iteration_bounds = array<i64: 1>, scalar_prefetch = 0 : i64, scratch_operands = 0 : i64, tpu.core_type = #tpu.core_type<tc>, window_params = [{transform_indices = @transform_0, window_bounds = array<i64: 18>}, {pipeline_mode = #tpu.pipeline_mode<synchronous>, transform_indices = @transform_1, window_bounds = array<i64: 2, 256>}, {transform_indices = @transform_2, window_bounds = array<i64: 2, 4, 256>}, {transform_indices = @transform_3, window_bounds = array<i64: 2, 1, 256>}]} {
    %c0 = arith.constant 0 : index
    %c0_0 = arith.constant 0 : index
    %c0_1 = arith.constant 0 : index
    %0 = vector.load %arg3[%c0, %c0_0, %c0_1] : memref<2x4x256xf32, #tpu.memory_space<vmem>>, vector<2x1x256xf32>
    %1 = vector.shape_cast %0 : vector<2x1x256xf32> to vector<2x256xf32>
    %c0_2 = arith.constant 0 : index
    %c1 = arith.constant 1 : index
    %c0_3 = arith.constant 0 : index
    %2 = vector.load %arg3[%c0_2, %c1, %c0_3] : memref<2x4x256xf32, #tpu.memory_space<vmem>>, vector<2x1x256xf32>
    %3 = vector.shape_cast %2 : vector<2x1x256xf32> to vector<2x256xf32>
    %4 = arith.addf %1, %3 : vector<2x256xf32>
    %5 = arith.maximumf %1, %3 : vector<2x256xf32>
    %c0_4 = arith.constant 0 : index
    %c2 = arith.constant 2 : index
    %c0_5 = arith.constant 0 : index
    %6 = vector.load %arg3[%c0_4, %c2, %c0_5] : memref<2x4x256xf32, #tpu.memory_space<vmem>>, vector<2x1x256xf32>
    %7 = vector.shape_cast %6 : vector<2x1x256xf32> to vector<2x256xf32>
    %8 = arith.addf %4, %7 : vector<2x256xf32>
    %9 = arith.maximumf %5, %7 : vector<2x256xf32>
    %c0_6 = arith.constant 0 : index
    %c3 = arith.constant 3 : index
    %c0_7 = arith.constant 0 : index
    %10 = vector.load %arg3[%c0_6, %c3, %c0_7] : memref<2x4x256xf32, #tpu.memory_space<vmem>>, vector<2x1x256xf32>
    %11 = vector.shape_cast %10 : vector<2x1x256xf32> to vector<2x256xf32>
    %12 = arith.addf %8, %11 : vector<2x256xf32>
    %13 = arith.maximumf %9, %11 : vector<2x256xf32>
    %cst = arith.constant 2.500000e-01 : f32
    %14 = vector.broadcast %cst : f32 to vector<2x256xf32>
    %15 = arith.mulf %12, %14 : vector<2x256xf32>
    %c0_8 = arith.constant 0 : index
    %c0_9 = arith.constant 0 : index
    %16 = vector.load %arg2[%c0_8, %c0_9] : memref<2x256xi32, #tpu.memory_space<vmem>>, vector<1x256xi32>
    %c1_10 = arith.constant 1 : index
    %c0_11 = arith.constant 0 : index
    %17 = vector.load %arg2[%c1_10, %c0_11] : memref<2x256xi32, #tpu.memory_space<vmem>>, vector<1x256xi32>
    %c1_i32 = arith.constant 1 : i32
    %18 = vector.broadcast %c1_i32 : i32 to vector<1x256xi32>
    %19 = arith.cmpi sge, %16, %18 : vector<1x256xi32>
    %c14_i32 = arith.constant 14 : i32
    %20 = vector.broadcast %c14_i32 : i32 to vector<1x256xi32>
    %21 = arith.cmpi sle, %16, %20 : vector<1x256xi32>
    %c1_i32_12 = arith.constant 1 : i32
    %22 = vector.broadcast %c1_i32_12 : i32 to vector<1x256xi32>
    %23 = arith.cmpi sge, %17, %22 : vector<1x256xi32>
    %c14_i32_13 = arith.constant 14 : i32
    %24 = vector.broadcast %c14_i32_13 : i32 to vector<1x256xi32>
    %25 = arith.cmpi sle, %17, %24 : vector<1x256xi32>
    %c4 = arith.constant 4 : index
    %26 = memref.load %arg1[%c4] : memref<18xf32, #tpu.memory_space<smem>>
    %27 = vector.broadcast %26 : f32 to vector<2x256xf32>
    %28 = arith.mulf %27, %15 : vector<2x256xf32>
    %c13 = arith.constant 13 : index
    %29 = memref.load %arg1[%c13] : memref<18xf32, #tpu.memory_space<smem>>
    %30 = vector.broadcast %29 : f32 to vector<2x256xf32>
    %31 = arith.mulf %30, %13 : vector<2x256xf32>
    %32 = arith.addf %28, %31 : vector<2x256xf32>
    %c17_i32 = arith.constant 17 : i32
    %33 = tpu.dynamic_rotate %15 by %c17_i32 dim 1 : vector<2x256xf32>, i32 -> vector<2x256xf32>
    %c17_i32_14 = arith.constant 17 : i32
    %34 = tpu.dynamic_rotate %13 by %c17_i32_14 dim 1 : vector<2x256xf32>, i32 -> vector<2x256xf32>
    %c0_15 = arith.constant 0 : index
    %35 = memref.load %arg1[%c0_15] : memref<18xf32, #tpu.memory_space<smem>>
    %36 = vector.broadcast %35 : f32 to vector<2x256xf32>
    %37 = arith.mulf %36, %33 : vector<2x256xf32>
    %c9 = arith.constant 9 : index
    %38 = memref.load %arg1[%c9] : memref<18xf32, #tpu.memory_space<smem>>
    %39 = vector.broadcast %38 : f32 to vector<2x256xf32>
    %40 = arith.mulf %39, %34 : vector<2x256xf32>
    %41 = arith.addf %37, %40 : vector<2x256xf32>
    %42 = arith.andi %19, %23 : vector<1x256xi1>
    %cst_16 = arith.constant 0.000000e+00 : f32
    %43 = vector.shape_cast %42 : vector<1x256xi1> to vector<1x256xi1>
    %44 = vector.broadcast %43 : vector<1x256xi1> to vector<2x256xi1>
    %45 = vector.broadcast %cst_16 : f32 to vector<2x256xf32>
    %46 = arith.select %44, %41, %45 : vector<2x256xi1>, vector<2x256xf32>
    %47 = arith.addf %32, %46 : vector<2x256xf32>
    %c16_i32 = arith.constant 16 : i32
    %48 = tpu.dynamic_rotate %15 by %c16_i32 dim 1 : vector<2x256xf32>, i32 -> vector<2x256xf32>
    %c16_i32_17 = arith.constant 16 : i32
    %49 = tpu.dynamic_rotate %13 by %c16_i32_17 dim 1 : vector<2x256xf32>, i32 -> vector<2x256xf32>
    %c1_18 = arith.constant 1 : index
    %50 = memref.load %arg1[%c1_18] : memref<18xf32, #tpu.memory_space<smem>>
    %51 = vector.broadcast %50 : f32 to vector<2x256xf32>
    %52 = arith.mulf %51, %48 : vector<2x256xf32>
    %c10 = arith.constant 10 : index
    %53 = memref.load %arg1[%c10] : memref<18xf32, #tpu.memory_space<smem>>
    %54 = vector.broadcast %53 : f32 to vector<2x256xf32>
    %55 = arith.mulf %54, %49 : vector<2x256xf32>
    %56 = arith.addf %52, %55 : vector<2x256xf32>
    %cst_19 = arith.constant 0.000000e+00 : f32
    %57 = vector.shape_cast %19 : vector<1x256xi1> to vector<1x256xi1>
    %58 = vector.broadcast %57 : vector<1x256xi1> to vector<2x256xi1>
    %59 = vector.broadcast %cst_19 : f32 to vector<2x256xf32>
    %60 = arith.select %58, %56, %59 : vector<2x256xi1>, vector<2x256xf32>
    %61 = arith.addf %47, %60 : vector<2x256xf32>
    %c15_i32 = arith.constant 15 : i32
    %62 = tpu.dynamic_rotate %15 by %c15_i32 dim 1 : vector<2x256xf32>, i32 -> vector<2x256xf32>
    %c15_i32_20 = arith.constant 15 : i32
    %63 = tpu.dynamic_rotate %13 by %c15_i32_20 dim 1 : vector<2x256xf32>, i32 -> vector<2x256xf32>
    %c2_21 = arith.constant 2 : index
    %64 = memref.load %arg1[%c2_21] : memref<18xf32, #tpu.memory_space<smem>>
    %65 = vector.broadcast %64 : f32 to vector<2x256xf32>
    %66 = arith.mulf %65, %62 : vector<2x256xf32>
    %c11 = arith.constant 11 : index
    %67 = memref.load %arg1[%c11] : memref<18xf32, #tpu.memory_space<smem>>
    %68 = vector.broadcast %67 : f32 to vector<2x256xf32>
    %69 = arith.mulf %68, %63 : vector<2x256xf32>
    %70 = arith.addf %66, %69 : vector<2x256xf32>
    %71 = arith.andi %19, %25 : vector<1x256xi1>
    %cst_22 = arith.constant 0.000000e+00 : f32
    %72 = vector.shape_cast %71 : vector<1x256xi1> to vector<1x256xi1>
    %73 = vector.broadcast %72 : vector<1x256xi1> to vector<2x256xi1>
    %74 = vector.broadcast %cst_22 : f32 to vector<2x256xf32>
    %75 = arith.select %73, %70, %74 : vector<2x256xi1>, vector<2x256xf32>
    %76 = arith.addf %61, %75 : vector<2x256xf32>
    %c1_i32_23 = arith.constant 1 : i32
    %77 = tpu.dynamic_rotate %15 by %c1_i32_23 dim 1 : vector<2x256xf32>, i32 -> vector<2x256xf32>
    %c1_i32_24 = arith.constant 1 : i32
    %78 = tpu.dynamic_rotate %13 by %c1_i32_24 dim 1 : vector<2x256xf32>, i32 -> vector<2x256xf32>
    %c3_25 = arith.constant 3 : index
    %79 = memref.load %arg1[%c3_25] : memref<18xf32, #tpu.memory_space<smem>>
    %80 = vector.broadcast %79 : f32 to vector<2x256xf32>
    %81 = arith.mulf %80, %77 : vector<2x256xf32>
    %c12 = arith.constant 12 : index
    %82 = memref.load %arg1[%c12] : memref<18xf32, #tpu.memory_space<smem>>
    %83 = vector.broadcast %82 : f32 to vector<2x256xf32>
    %84 = arith.mulf %83, %78 : vector<2x256xf32>
    %85 = arith.addf %81, %84 : vector<2x256xf32>
    %cst_26 = arith.constant 0.000000e+00 : f32
    %86 = vector.shape_cast %23 : vector<1x256xi1> to vector<1x256xi1>
    %87 = vector.broadcast %86 : vector<1x256xi1> to vector<2x256xi1>
    %88 = vector.broadcast %cst_26 : f32 to vector<2x256xf32>
    %89 = arith.select %87, %85, %88 : vector<2x256xi1>, vector<2x256xf32>
    %90 = arith.addf %76, %89 : vector<2x256xf32>
    %c255_i32 = arith.constant 255 : i32
    %91 = tpu.dynamic_rotate %15 by %c255_i32 dim 1 : vector<2x256xf32>, i32 -> vector<2x256xf32>
    %c255_i32_27 = arith.constant 255 : i32
    %92 = tpu.dynamic_rotate %13 by %c255_i32_27 dim 1 : vector<2x256xf32>, i32 -> vector<2x256xf32>
    %c5 = arith.constant 5 : index
    %93 = memref.load %arg1[%c5] : memref<18xf32, #tpu.memory_space<smem>>
    %94 = vector.broadcast %93 : f32 to vector<2x256xf32>
    %95 = arith.mulf %94, %91 : vector<2x256xf32>
    %c14 = arith.constant 14 : index
    %96 = memref.load %arg1[%c14] : memref<18xf32, #tpu.memory_space<smem>>
    %97 = vector.broadcast %96 : f32 to vector<2x256xf32>
    %98 = arith.mulf %97, %92 : vector<2x256xf32>
    %99 = arith.addf %95, %98 : vector<2x256xf32>
    %cst_28 = arith.constant 0.000000e+00 : f32
    %100 = vector.shape_cast %25 : vector<1x256xi1> to vector<1x256xi1>
    %101 = vector.broadcast %100 : vector<1x256xi1> to vector<2x256xi1>
    %102 = vector.broadcast %cst_28 : f32 to vector<2x256xf32>
    %103 = arith.select %101, %99, %102 : vector<2x256xi1>, vector<2x256xf32>
    %104 = arith.addf %90, %103 : vector<2x256xf32>
    %c241_i32 = arith.constant 241 : i32
    %105 = tpu.dynamic_rotate %15 by %c241_i32 dim 1 : vector<2x256xf32>, i32 -> vector<2x256xf32>
    %c241_i32_29 = arith.constant 241 : i32
    %106 = tpu.dynamic_rotate %13 by %c241_i32_29 dim 1 : vector<2x256xf32>, i32 -> vector<2x256xf32>
    %c6 = arith.constant 6 : index
    %107 = memref.load %arg1[%c6] : memref<18xf32, #tpu.memory_space<smem>>
    %108 = vector.broadcast %107 : f32 to vector<2x256xf32>
    %109 = arith.mulf %108, %105 : vector<2x256xf32>
    %c15 = arith.constant 15 : index
    %110 = memref.load %arg1[%c15] : memref<18xf32, #tpu.memory_space<smem>>
    %111 = vector.broadcast %110 : f32 to vector<2x256xf32>
    %112 = arith.mulf %111, %106 : vector<2x256xf32>
    %113 = arith.addf %109, %112 : vector<2x256xf32>
    %114 = arith.andi %21, %23 : vector<1x256xi1>
    %cst_30 = arith.constant 0.000000e+00 : f32
    %115 = vector.shape_cast %114 : vector<1x256xi1> to vector<1x256xi1>
    %116 = vector.broadcast %115 : vector<1x256xi1> to vector<2x256xi1>
    %117 = vector.broadcast %cst_30 : f32 to vector<2x256xf32>
    %118 = arith.select %116, %113, %117 : vector<2x256xi1>, vector<2x256xf32>
    %119 = arith.addf %104, %118 : vector<2x256xf32>
    %c240_i32 = arith.constant 240 : i32
    %120 = tpu.dynamic_rotate %15 by %c240_i32 dim 1 : vector<2x256xf32>, i32 -> vector<2x256xf32>
    %c240_i32_31 = arith.constant 240 : i32
    %121 = tpu.dynamic_rotate %13 by %c240_i32_31 dim 1 : vector<2x256xf32>, i32 -> vector<2x256xf32>
    %c7 = arith.constant 7 : index
    %122 = memref.load %arg1[%c7] : memref<18xf32, #tpu.memory_space<smem>>
    %123 = vector.broadcast %122 : f32 to vector<2x256xf32>
    %124 = arith.mulf %123, %120 : vector<2x256xf32>
    %c16 = arith.constant 16 : index
    %125 = memref.load %arg1[%c16] : memref<18xf32, #tpu.memory_space<smem>>
    %126 = vector.broadcast %125 : f32 to vector<2x256xf32>
    %127 = arith.mulf %126, %121 : vector<2x256xf32>
    %128 = arith.addf %124, %127 : vector<2x256xf32>
    %cst_32 = arith.constant 0.000000e+00 : f32
    %129 = vector.shape_cast %21 : vector<1x256xi1> to vector<1x256xi1>
    %130 = vector.broadcast %129 : vector<1x256xi1> to vector<2x256xi1>
    %131 = vector.broadcast %cst_32 : f32 to vector<2x256xf32>
    %132 = arith.select %130, %128, %131 : vector<2x256xi1>, vector<2x256xf32>
    %133 = arith.addf %119, %132 : vector<2x256xf32>
    %c239_i32 = arith.constant 239 : i32
    %134 = tpu.dynamic_rotate %15 by %c239_i32 dim 1 : vector<2x256xf32>, i32 -> vector<2x256xf32>
    %c239_i32_33 = arith.constant 239 : i32
    %135 = tpu.dynamic_rotate %13 by %c239_i32_33 dim 1 : vector<2x256xf32>, i32 -> vector<2x256xf32>
    %c8 = arith.constant 8 : index
    %136 = memref.load %arg1[%c8] : memref<18xf32, #tpu.memory_space<smem>>
    %137 = vector.broadcast %136 : f32 to vector<2x256xf32>
    %138 = arith.mulf %137, %134 : vector<2x256xf32>
    %c17 = arith.constant 17 : index
    %139 = memref.load %arg1[%c17] : memref<18xf32, #tpu.memory_space<smem>>
    %140 = vector.broadcast %139 : f32 to vector<2x256xf32>
    %141 = arith.mulf %140, %135 : vector<2x256xf32>
    %142 = arith.addf %138, %141 : vector<2x256xf32>
    %143 = arith.andi %21, %25 : vector<1x256xi1>
    %cst_34 = arith.constant 0.000000e+00 : f32
    %144 = vector.shape_cast %143 : vector<1x256xi1> to vector<1x256xi1>
    %145 = vector.broadcast %144 : vector<1x256xi1> to vector<2x256xi1>
    %146 = vector.broadcast %cst_34 : f32 to vector<2x256xf32>
    %147 = arith.select %145, %142, %146 : vector<2x256xi1>, vector<2x256xf32>
    %148 = arith.addf %133, %147 : vector<2x256xf32>
    %149 = arith.negf %148 : vector<2x256xf32>
    %150 = math.exp %149 : vector<2x256xf32>
    %cst_35 = arith.constant 1.000000e+00 : f32
    %151 = vector.broadcast %cst_35 : f32 to vector<2x256xf32>
    %152 = arith.addf %151, %150 : vector<2x256xf32>
    %153 = arith.divf %151, %152 : vector<2x256xf32>
    %c0_36 = arith.constant 0 : index
    %c0_37 = arith.constant 0 : index
    %c0_38 = arith.constant 0 : index
    %154 = vector.load %arg4[%c0_36, %c0_37, %c0_38] : memref<2x1x256xf32, #tpu.memory_space<vmem>>, vector<2x1x256xf32>
    %155 = vector.shape_cast %154 : vector<2x1x256xf32> to vector<2x256xf32>
    %156 = vector.shape_cast %153 : vector<2x256xf32> to vector<2x1x256xf32>
    tpu.vector_store %arg4[%c0_36, %c0_37, %c0_38], %156 {strides = array<i32>} : memref<2x1x256xf32, #tpu.memory_space<vmem>>, vector<2x1x256xf32>,
    return
  }
  func.func @transform_0(%arg0: i32) -> i32 {
    %c0_i32 = arith.constant 0 : i32
    %c0_i32_0 = arith.constant 0 : i32
    return %c0_i32 : i32
  }
  func.func @transform_1(%arg0: i32) -> (i32, i32) {
    %c0_i32 = arith.constant 0 : i32
    %c0_i32_0 = arith.constant 0 : i32
    %c0_i32_1 = arith.constant 0 : i32
    return %c0_i32, %c0_i32_0 : i32, i32
  }
  func.func @transform_2(%arg0: i32) -> (i32, i32, i32) {
    %c0_i32 = arith.constant 0 : i32
    %c0_i32_0 = arith.constant 0 : i32
    %c0_i32_1 = arith.constant 0 : i32
    return %arg0, %c0_i32, %c0_i32_0 : i32, i32, i32
  }
  func.func @transform_3(%arg0: i32) -> (i32, i32, i32) {
    %c0_i32 = arith.constant 0 : i32
    %c0_i32_0 = arith.constant 0 : i32
    %c0_i32_1 = arith.constant 0 : i32
    return %arg0, %c0_i32, %c0_i32_0 : i32, i32, i32
  }
}

</mosaic_0001>

<bundles_post_ra>
// kernel: tpu_custom_call.1
= control target key start
LH: loop header
LB: loop body
LE: loop exit
PB: predicated region body
PF: predicated region fallthrough
CT: control target
= control target key end

     0   :  { %8 = vsyncpa [#allocation5], 0  ;;  %s1236_s0 = inlined_call_operand.hbm [shape: f32[18], index: 0, kind: input, shape index: {}]   ;;  %s1237_s1 = inlined_call_operand.hbm [shape: s32[2,256], index: 1, kind: input, shape index: {}]   ;;  %s1238_s2 = inlined_call_operand.hbm [shape: f32[2,4,256], index: 2, kind: input, shape index: {}]   ;;  %s1239_s3 = inlined_call_operand.hbm [shape: f32[2,1,256], index: 3, kind: output, shape index: {}]  }
   0x1   :  { %9 = vsyncpa [#allocation3], 0 }
   0x2   :  { %10 = vsyncpa [#allocation8], 0 }
   0x3   :  { %11 = vsyncpa [#allocation4], 0  ;;  %s760_s14 = scalar_lea.hbm %s1236_s0, 16 }
   0x4   :  { %p761_p0 = scmp.ne.s32.totalorder %s1236_s0, %s760_s14  ;;  %p764_p1 = scmp.lt.u32.totalorder %s760_s14, %s1236_s0 }
   0x6   :  { %p766_p2 = pnand %p764_p1, %p761_p0 }
   0x8   :  { %769 = shalt.err (!%p766_p2)
}
   0x9   :  { %s844_s19 = smov [#allocation2]   ;;  %s845_s22 = smov [#allocation6]  }
   0xa   :  { %19 = dma.hbm_to_smem %s1236_s0, 16, %s844_s19, [#allocation5]  }
   0xb   :  { %s26_s23 = sshll.u32 %s845_s22, 4  ;;  %s846_s24 = smov [#allocation7]   ;;  %s27_s23 = int_to_ptr.vmem [resolvable:$true] %s26_s23 }
   0xc   :  { %s35_s25 = sshll.u32 %s846_s24, 4  ;;  %s770_s28 = scalar_lea.hbm %s1237_s1, 64  ;;  %s36_s25 = int_to_ptr.vmem [resolvable:$true] %s35_s25 }
   0xd   :  { %p771_p3 = scmp.ne.s32.totalorder %s1237_s1, %s770_s28  ;;  %p774_p4 = scmp.lt.u32.totalorder %s770_s28, %s1237_s1 }
   0xf   :  { %p776_p5 = pnand %p774_p4, %p771_p3 }
  0x11   :  { %779 = shalt.err (!%p776_p5)
}
  0x12   :  { %s780_s0 = scalar_lea.vmem %s27_s23, 64  ;;  %p785_p7 = scmp.lt.s32.totalorder %s27_s23, %s27_s23 }
  0x13   :  { %p781_p6 = scmp.ne.s32.totalorder %s27_s23, %s780_s0  ;;  %p786_p8 = scmp.lt.s32.totalorder %s780_s0, %s780_s0 }
  0x15   :  { %p787_p9 = por %p786_p8, %p785_p7 }
  0x17   :  { %p788_p10 = pnand %p787_p9, %p781_p6 }
  0x19   :  { %791 = shalt.err (!%p788_p10)
}
  0x1a   :  { %29 = dma.hbm_to_vmem [thread:$0]  %s1237_s1, 64, %s27_s23, [#allocation3]  }
  0x1b   :  { %s792_s10 = scalar_lea.hbm %s1238_s2, 256 }
  0x1c   :  { %p793_p11 = scmp.ne.s32.totalorder %s1238_s2, %s792_s10  ;;  %p796_p12 = scmp.lt.u32.totalorder %s792_s10, %s1238_s2 }
  0x1e   :  { %p798_p13 = pnand %p796_p12, %p793_p11 }
  0x20   :  { %801 = shalt.err (!%p798_p13)
}
  0x21   :  { %s802_s15 = scalar_lea.vmem %s36_s25, 256  ;;  %p807_p1 = scmp.lt.s32.totalorder %s36_s25, %s36_s25 }
  0x22   :  { %p803_p0 = scmp.ne.s32.totalorder %s36_s25, %s802_s15  ;;  %p808_p2 = scmp.lt.s32.totalorder %s802_s15, %s802_s15 }
  0x24   :  { %p809_p3 = por %p808_p2, %p807_p1 }
  0x26   :  { %p810_p4 = pnand %p809_p3, %p803_p0 }
  0x28   :  { %813 = shalt.err (!%p810_p4)
}
  0x29   :  { %s847_s1 = smov 128   ;;  %s848_s16 = smov 8  }
  0x2a   :  { %41 = dma.hbm_to_vmem [thread:$0]  %s1238_s2, 256, %s36_s25, [#allocation8], %s847_s1, %s847_s1, %s848_s16  }
  0x2b   :  { %836 = dma.done.wait [#allocation5], 16  }
  0x2c   :  { %837 = vsyncadd [#allocation5], 4294967280 }
  0x2d   :  { %838 = dma.done.wait [#allocation3], 64  }
  0x2e   :  { %839 = vsyncadd [#allocation3], 4294967232 }
  0x2f   :  { %840 = dma.done.wait [#allocation8], 256  }
  0x30   :  { %841 = vsyncadd [#allocation8], 4294967040 }
  0x31   :  { %51 = sfence }
  0x32   :  { %v52_v0 = vld [vmem:[#allocation7] ss:$4 sm:$0x3]  ;;  %v54_v1 = vld [vmem:[#allocation7 + $0x8] ss:$4 sm:$0x3]  ;;  %v104_v4 = vlaneseq }
  0x33   :  { %v56_v2 = vld [vmem:[#allocation7 + $0x1] ss:$4 sm:$0x3]  ;;  %v58_v3 = vld [vmem:[#allocation7 + $0x9] ss:$4 sm:$0x3] }
  0x34   :  { %v61_v5 = vmax.f32 %v52_v0, %v56_v2  ;;  %v62_v6 = vmax.f32 %v54_v1, %v58_v3  ;;  %v64_v7 = vld [vmem:[#allocation7 + $0x2] ss:$4 sm:$0x3]  ;;  %v66_v8 = vld [vmem:[#allocation7 + $0xa] ss:$4 sm:$0x3]  ;;  %v59_v9 = vadd.f32 %v56_v2, %v52_v0  ;;  %v60_v10 = vadd.f32 %v58_v3, %v54_v1 }
  0x35   :  { %v72_v11 = vld [vmem:[#allocation7 + $0x3] ss:$4 sm:$0x3]  ;;  %v74_v12 = vld [vmem:[#allocation7 + $0xb] ss:$4 sm:$0x3] }
  0x36   :  { %v69_v13 = vmax.f32 %v61_v5, %v64_v7  ;;  %v70_v14 = vmax.f32 %v62_v6, %v66_v8  ;;  %v849_v15 = vmov 1966171168   ;;  %v919_v17 = vshrl.u32 %v104_v4, 7  ;;  %s850_s2 = smov 16   ;;  %s851_s19 = smov 17  }
  0x37   :  { %v102_v16 = vunpack.c.l.s4 %v849_v15  ;;  %v67_v18 = vadd.f32 %v64_v7, %v59_v9  ;;  %v68_v19 = vadd.f32 %v66_v8, %v60_v10  ;;  %s715_s20 = sld [smem:[#allocation2 + $0x4]]  ;;  %s716_s21 = sld [smem:[#allocation2 + $0xd]]  ;;  %v934_v46 = vld [vmem:[#allocation6] ss:$2 sm:$0x3]  ;;  %v955_v53 = vand.u32 127, %v104_v4 }
  0x38   :  { %v77_v20 = vmax.f32 %v69_v13, %v72_v11  ;;  %v78_v21 = vmax.f32 %v70_v14, %v74_v12  ;;  %s852_s22 = smov 15   ;;  %s853_s23 = smov 1   ;;  %v936_v47 = vld [vmem:[#allocation6 + $0x1] ss:$2 sm:$0x3]  ;;  %vm84_vm0 = vcmp.ge.s32.totalorder %v934_v46, 1 }
  0x39   :  { %v103_v22 = vunpack.c.0.s8 %v102_v16  ;;  %v75_v23 = vadd.f32 %v72_v11, %v67_v18  ;;  %v76_v24 = vadd.f32 %v74_v12, %v68_v19  ;;  %s854_s24 = smov 127   ;;  %s855_s25 = smov 113   ;;  %vm86_vm1 = vcmp.ge.s32.totalorder %v936_v47, 1 }
  0x3a   :  { %v136_v25 = vcombine.low %v77_v20, %v78_v21  ;;  %s856_s26 = smov 112   ;;  %s857_s27 = smov 111   ;;  %v947_v52 = vsub.s32 0, %v919_v17  ;;  %vm87_vm2 = vcmp.le.s32.totalorder %v936_v47, 14  ;;  %v958_v54 = vsub.s32 1, %v919_v17  ;;  %vm177_vm3 = vmand %vm84_vm0, %vm86_vm1 }
  0x3b   :  { %v922_v26 = vsub.s32 %v103_v22, %v919_v17  ;;  %v79_v27 = vmul.f32 0.25, %v75_v23  ;;  %v80_v28 = vmul.f32 0.25, %v76_v24  ;;  %s938_s28 = sld [smem:[#allocation2 + $0x9]]  ;;  %s940_s29 = sld [smem:[#allocation2 + $0xa]]  ;;  %v858_v55 = vmov 0   ;;  %vm308_vm4 = vmand %vm84_vm0, %vm87_vm2 }
  0x3c   :  { %s943_s30 = sld [smem:[#allocation2 + $0x1]]  ;;  %s949_s4 = sld [smem:[#allocation2 + $0x2]]  ;;  %v243_v56 = vsel %vm84_vm0, 1, %v858_v55  ;;  %vm224_vm5 = vcmp.lt.s32.totalorder %v955_v53, 16  ;;  %v178_v60 = vsel %vm177_vm3, 1, %v858_v55  ;;  %vm131_vm6 = vcmp.lt.s32.totalorder %v955_v53, 17 }
  0x3d   :  { %v143_v29 = vrot.slane %v136_v25, %v922_v26  ;;  %v100_v30 = vcombine.low %v79_v27, %v80_v28  ;;  %v89_v38 = vstv %s715_s20  ;;  %v93_v39 = vstv %s716_s21  ;;  %s951_s5 = sld [smem:[#allocation2]]  ;;  %s968_s0 = sld [smem:[#allocation2 + $0xb]] }
  0x3e   :  { %v91_v40 = vmul.f32 %v89_v38, %v80_v28  ;;  %v94_v41 = vmul.f32 %v93_v39, %v77_v20  ;;  %v95_v42 = vmul.f32 %v93_v39, %v78_v21  ;;  %v90_v43 = vmul.f32 %v89_v38, %v79_v27  ;;  %s998_s6 = sld [smem:[#allocation2 + $0x3]]  ;;  %s1012_s7 = sld [smem:[#allocation2 + $0xc]] }
  0x3f   :  { %v151_v31 = vrot.slane %v143_v29, %v922_v26  ;;  %v144_v32 = vcombine.high %v143_v29, %v143_v29  ;;  %v107_v33 = vrot.slane %v100_v30, %v922_v26  ;;  %v247_v59 = vrot.slane %v243_v56, %v947_v52  ;;  %s1033_s8 = sld [smem:[#allocation2 + $0x5]]  ;;  %s1055_s9 = sld [smem:[#allocation2 + $0xe]] }
  0x40   :  { %v930_v44 = vadd.f32 %v95_v42, %v91_v40  ;;  %v932_v45 = vadd.f32 %v94_v41, %v90_v43  ;;  %v251_v61 = vrot.slane %v243_v56, %v958_v54  ;;  %v309_v1 = vsel %vm308_vm4, 1, %v858_v55  ;;  %s1094_s10 = sld [smem:[#allocation2 + $0x6]]  ;;  %s1097_s11 = sld [smem:[#allocation2 + $0xf]] }
  0x41   :  { %227 = vrot.lane.b32.xlu0 %v151_v31, %s850_s2  ;;  %161 = vrot.lane.b32.xlu1 %v151_v31, %s851_s19  ;;  %v158_v34 = vrot.slane %v144_v32, %v922_v26  ;;  %v115_v35 = vrot.slane %v107_v33, %v922_v26  ;;  %v108_v36 = vcombine.high %v107_v33, %v107_v33  ;;  %v172_v62 = vstv %s938_s28  ;;  %s1131_s12 = sld [smem:[#allocation2 + $0x7]]  ;;  %s1139_s13 = sld [smem:[#allocation2 + $0x10]] }
  0x42   :  { %v238_v63 = vstv %s940_s29  ;;  %v234_v0 = vstv %s943_s30  ;;  %v182_v5 = vrot.slane %v178_v60, %v947_v52  ;;  %v186_v6 = vrot.slane %v178_v60, %v958_v54  ;;  %s1166_s14 = sld [smem:[#allocation2 + $0x8]]  ;;  %s1168_s15 = sld [smem:[#allocation2 + $0x11]] }
  0x43   :  { %v122_v37 = vrot.slane %v108_v36, %v922_v26  ;;  %vm982_vm7 = vcmp.eq.s32.totalorder %v247_v59, 1  ;;  %vm289_vm8 = vcmp.lt.s32.totalorder %v955_v53, 15  ;;  %v299_v10 = vstv %s949_s4  ;;  %s859_s1 = smov [#allocation9]  }
  0x44   :  { %v168_v11 = vstv %s951_s5  ;;  %vm989_vm9 = vcmp.eq.s32.totalorder %v251_v61, 1  ;;  %v313_v15 = vrot.slane %v309_v1, %v947_v52  ;;  %vm1004_vm10 = vcmp.eq.s32.totalorder %v182_v5, 1  ;;  %s701_s16 = sshll.u32 %s859_s1, 4  ;;  %s702_s16 = int_to_ptr.vmem [resolvable:$true] %s701_s16 }
  0x45   :  { %163 = vrot.lane.b32.xlu1 %v158_v34, %s851_s19  ;;  %125 = vrot.lane.b32.xlu0 %v115_v35, %s851_s19  ;;  %vm1008_vm11 = vcmp.eq.s32.totalorder %v186_v6, 1  ;;  %v303_v29 = vstv %s968_s0  ;;  %v317_v30 = vrot.slane %v309_v1, %v958_v54  ;;  %vm355_vm14 = vcmp.lt.s32.totalorder %v955_v53, 1  ;;  %s814_s17 = scalar_lea.vmem %s702_s16, 64  ;;  %p819_p6 = scmp.lt.s32.totalorder %s702_s16, %s702_s16 }
  0x46   :  { %vm1020_vm12 = vcmp.eq.s32.totalorder %v313_v15, 1  ;;  %vm420_vm3 = vcmp.lt.s32.totalorder %v955_v53, 127  ;;  %vm85_vm4 = vcmp.le.s32.totalorder %v934_v46, 14  ;;  %p815_p5 = scmp.ne.s32.totalorder %s702_s16, %s814_s17  ;;  %p820_p7 = scmp.lt.s32.totalorder %s814_s17, %s814_s17 }
  0x47   :  { %vm1035_vm13 = vcmp.eq.s32.totalorder %v317_v30, 1 }
  0x48   :  { %p821_p8 = por %p820_p7, %p819_p6 }
  0x49   :  { %229 = vrot.lane.b32.xlu1 %v158_v34, %s850_s2  ;;  %220 = vrot.lane.b32.xlu0 %v115_v35, %s850_s2 }
  0x4a   :  { %p822_p9 = pnand %p821_p8, %p815_p5 }
  0x4d   :  { %285 = vrot.lane.b32.xlu0 %v115_v35, %s852_s22  ;;  %222 = vrot.lane.b32.xlu1 %v122_v37, %s850_s2 }
  0x51   :  { %287 = vrot.lane.b32.xlu1 %v122_v37, %s852_s22  ;;  %127 = vrot.lane.b32.xlu0 %v122_v37, %s851_s19 }
  0x55   :  { %294 = vrot.lane.b32.xlu1 %v158_v34, %s852_s22  ;;  %292 = vrot.lane.b32.xlu0 %v151_v31, %s852_s22 }
  0x59   :  { %353 = vrot.lane.b32.xlu1 %v122_v37, %s853_s23  ;;  %351 = vrot.lane.b32.xlu0 %v115_v35, %s853_s23 }
  0x5d   :  { %360 = vrot.lane.b32.xlu1 %v158_v34, %s853_s23  ;;  %358 = vrot.lane.b32.xlu0 %v151_v31, %s853_s23 }
  0x61   :  { %418 = vrot.lane.b32.xlu1 %v122_v37, %s854_s24  ;;  %416 = vrot.lane.b32.xlu0 %v115_v35, %s854_s24 }
  0x65   :  { %425 = vrot.lane.b32.xlu1 %v158_v34, %s854_s24  ;;  %423 = vrot.lane.b32.xlu0 %v151_v31, %s854_s24 }
  0x69   :  { %483 = vrot.lane.b32.xlu1 %v122_v37, %s855_s25  ;;  %481 = vrot.lane.b32.xlu0 %v115_v35, %s855_s25 }
  0x6d   :  { %490 = vrot.lane.b32.xlu1 %v158_v34, %s855_s25  ;;  %488 = vrot.lane.b32.xlu0 %v151_v31, %s855_s25 }
  0x71   :  { %549 = vrot.lane.b32.xlu1 %v122_v37, %s856_s26  ;;  %547 = vrot.lane.b32.xlu0 %v115_v35, %s856_s26 }
  0x75   :  { %556 = vrot.lane.b32.xlu1 %v158_v34, %s856_s26  ;;  %554 = vrot.lane.b32.xlu0 %v151_v31, %s856_s26 }
  0x79   :  { %614 = vrot.lane.b32.xlu1 %v122_v37, %s857_s27  ;;  %612 = vrot.lane.b32.xlu0 %v115_v35, %s857_s27 }
  0x7d   :  { %621 = vrot.lane.b32.xlu1 %v158_v34, %s857_s27  ;;  %619 = vrot.lane.b32.xlu0 %v151_v31, %s857_s27  ;;  %v374_v34 = vsel %vm86_vm1, 1, %v858_v55 }
  0xb3   :  { %v228_v48 = vpop.permute.xlu0 %227  ;;  %v162_v49 = vpop.permute.xlu1 %161 }
  0xb7   :  { %v164_v50 = vpop.permute.xlu1 %163  ;;  %v126_v51 = vpop.permute.xlu0 %125 }
  0xb8   :  { %v165_v20 = vsel %vm131_vm6, %v162_v49, %v164_v50  ;;  %v166_v21 = vsel %vm131_vm6, %v164_v50, %v162_v49  ;;  %v378_v50 = vrot.slane %v374_v34, %v947_v52 }
  0xb9   :  { %v173_v35 = vmul.f32 %v172_v62, %v166_v21  ;;  %v174_v36 = vmul.f32 %v172_v62, %v165_v20  ;;  %v430_v20 = vstv %s1033_s8  ;;  %v439_v21 = vsel %vm87_vm2, 1, %v858_v55 }
  0xba   :  { %vm1059_vm15 = vcmp.eq.s32.totalorder %v378_v50, 1 }
  0xbb   :  { %v230_v57 = vpop.permute.xlu1 %229  ;;  %v221_v58 = vpop.permute.xlu0 %220 }
  0xbc   :  { %v231_v2 = vsel %vm224_vm5, %v228_v48, %v230_v57  ;;  %v232_v3 = vsel %vm224_vm5, %v230_v57, %v228_v48 }
  0xbd   :  { %v239_v16 = vmul.f32 %v238_v63, %v232_v3  ;;  %v240_v17 = vmul.f32 %v238_v63, %v231_v2  ;;  %v365_v63 = vstv %s998_s6  ;;  %v369_v3 = vstv %s1012_s7 }
  0xbf   :  { %v286_v7 = vpop.permute.xlu0 %285  ;;  %v223_v9 = vpop.permute.xlu1 %222 }
  0xc0   :  { %v225_v13 = vsel %vm224_vm5, %v221_v58, %v223_v9  ;;  %v226_v14 = vsel %vm224_vm5, %v223_v9, %v221_v58 }
  0xc1   :  { %v235_v18 = vmul.f32 %v234_v0, %v226_v14  ;;  %v236_v19 = vmul.f32 %v234_v0, %v225_v13 }
  0xc3   :  { %v241_v24 = vadd.f32 %v239_v16, %v235_v18  ;;  %v242_v25 = vadd.f32 %v240_v17, %v236_v19  ;;  %v288_v27 = vpop.permute.xlu1 %287  ;;  %v128_v28 = vpop.permute.xlu0 %127 }
  0xc4   :  { %v132_v31 = vsel %vm131_vm6, %v126_v51, %v128_v28  ;;  %v133_v32 = vsel %vm131_vm6, %v128_v28, %v126_v51  ;;  %v290_v40 = vsel %vm289_vm8, %v286_v7, %v288_v27  ;;  %v382_v51 = vrot.slane %v374_v34, %v958_v54  ;;  %vm504_vm6 = vmand %vm85_vm4, %vm86_vm1 }
  0xc5   :  { %v254_v37 = vsel %vm982_vm7, %v241_v24, 0.0  ;;  %v255_v38 = vsel %vm989_vm9, %v242_v25, 0.0  ;;  %v169_v41 = vmul.f32 %v168_v11, %v133_v32  ;;  %v170_v42 = vmul.f32 %v168_v11, %v132_v31 }
  0xc6   :  { %v258_v39 = vcombine.low %v254_v37, %v255_v38  ;;  %v291_v56 = vsel %vm289_vm8, %v288_v27, %v286_v7  ;;  %v301_v60 = vmul.f32 %v299_v10, %v290_v40  ;;  %vm1063_vm0 = vcmp.eq.s32.totalorder %v382_v51, 1 }
  0xc7   :  { %v295_v43 = vpop.permute.xlu1 %294  ;;  %v293_v49 = vpop.permute.xlu0 %292  ;;  %v175_v57 = vadd.f32 %v173_v35, %v169_v41  ;;  %v176_v58 = vadd.f32 %v174_v36, %v170_v42  ;;  %v300_v5 = vmul.f32 %v299_v10, %v291_v56  ;;  %v443_v40 = vrot.slane %v439_v21, %v947_v52 }
  0xc8   :  { %v296_v59 = vsel %vm289_vm8, %v293_v49, %v295_v43  ;;  %v297_v61 = vsel %vm289_vm8, %v295_v43, %v293_v49  ;;  %v265_v0 = vrot.slane %v258_v39, %v922_v26  ;;  %v434_v39 = vstv %s1055_s9 }
  0xc9   :  { %v305_v62 = vmul.f32 %v303_v29, %v296_v59  ;;  %v189_v1 = vsel %vm1004_vm10, %v175_v57, 0.0  ;;  %v190_v2 = vsel %vm1008_vm11, %v176_v58, 0.0  ;;  %v304_v7 = vmul.f32 %v303_v29, %v297_v61  ;;  %vm635_vm11 = vmand %vm85_vm4, %vm87_vm2 }
  0xca   :  { %v193_v6 = vcombine.low %v189_v1, %v190_v2  ;;  %v266_v18 = vcombine.high %v265_v0, %v265_v0  ;;  %v273_v19 = vrot.slane %v265_v0, %v922_v26  ;;  %vm1108_vm5 = vcmp.eq.s32.totalorder %v443_v40, 1 }
  0xcb   :  { %v307_v8 = vadd.f32 %v305_v62, %v301_v60  ;;  %v354_v9 = vpop.permute.xlu1 %353  ;;  %v352_v11 = vpop.permute.xlu0 %351  ;;  %v306_v15 = vadd.f32 %v304_v7, %v300_v5  ;;  %vm485_vm1 = vcmp.lt.s32.totalorder %v955_v53, 113  ;;  %vm551_vm10 = vcmp.lt.s32.totalorder %v955_v53, 112 }
  0xcc   :  { %v357_v12 = vsel %vm355_vm14, %v354_v9, %v352_v11  ;;  %v200_v10 = vrot.slane %v193_v6, %v922_v26  ;;  %v356_v17 = vsel %vm355_vm14, %v352_v11, %v354_v9  ;;  %v280_v33 = vrot.slane %v266_v18, %v922_v26 }
  0xcd   :  { %v321_v16 = vsel %vm1035_vm13, %v307_v8, 0.0  ;;  %v320_v24 = vsel %vm1020_vm12, %v306_v15, 0.0  ;;  %v366_v25 = vmul.f32 %v365_v63, %v357_v12  ;;  %v367_v30 = vmul.f32 %v365_v63, %v356_v17 }
  0xce   :  { %v201_v22 = vcombine.high %v200_v10, %v200_v10  ;;  %v208_v23 = vrot.slane %v200_v10, %v922_v26  ;;  %v324_v29 = vcombine.low %v320_v24, %v321_v16  ;;  %v505_v15 = vsel %vm504_vm6, 1, %v858_v55 }
  0xcf   :  { %v361_v27 = vpop.permute.xlu1 %360  ;;  %v359_v28 = vpop.permute.xlu0 %358  ;;  %vm616_vm13 = vcmp.lt.s32.totalorder %v955_v53, 111 }
  0xd0   :  { %v362_v31 = vsel %vm355_vm14, %v359_v28, %v361_v27  ;;  %v363_v32 = vsel %vm355_vm14, %v361_v27, %v359_v28  ;;  %v215_v34 = vrot.slane %v201_v22, %v922_v26  ;;  %v218_v35 = vadd.f32 %v208_v23, %v932_v45 }
  0xd1   :  { %v370_v36 = vmul.f32 %v369_v3, %v363_v32  ;;  %v371_v37 = vmul.f32 %v369_v3, %v362_v31  ;;  %v331_v38 = vrot.slane %v324_v29, %v922_v26  ;;  %v447_v45 = vrot.slane %v439_v21, %v958_v54 }
  0xd2   :  { %v219_v41 = vadd.f32 %v215_v34, %v930_v44  ;;  %v283_v42 = vadd.f32 %v273_v19, %v218_v35  ;;  %v495_v22 = vstv %s1094_s10  ;;  %v499_v23 = vstv %s1097_s11 }
  0xd3   :  { %v372_v43 = vadd.f32 %v370_v36, %v366_v25  ;;  %v373_v48 = vadd.f32 %v371_v37, %v367_v30  ;;  %v419_v49 = vpop.permute.xlu1 %418  ;;  %v417_v50 = vpop.permute.xlu0 %416  ;;  %v332_v51 = vcombine.high %v331_v38, %v331_v38  ;;  %v339_v56 = vrot.slane %v331_v38, %v922_v26 }
  0xd4   :  { %v284_v57 = vadd.f32 %v280_v33, %v219_v41  ;;  %v421_v59 = vsel %vm420_vm3, %v417_v50, %v419_v49  ;;  %v422_v63 = vsel %vm420_vm3, %v419_v49, %v417_v50  ;;  %vm1122_vm7 = vcmp.eq.s32.totalorder %v447_v45, 1 }
  0xd5   :  { %v385_v44 = vsel %vm1059_vm15, %v372_v43, 0.0  ;;  %v386_v58 = vsel %vm1063_vm0, %v373_v48, 0.0  ;;  %v346_v60 = vrot.slane %v332_v51, %v922_v26  ;;  %v349_v61 = vadd.f32 %v339_v56, %v283_v42 }
  0xd6   :  { %v389_v62 = vcombine.low %v385_v44, %v386_v58  ;;  %v431_v8 = vmul.f32 %v430_v20, %v421_v59  ;;  %v432_v9 = vmul.f32 %v430_v20, %v422_v63  ;;  %v509_v27 = vrot.slane %v505_v15, %v947_v52 }
  0xd7   :  { %v426_v0 = vpop.permute.xlu1 %425  ;;  %v424_v2 = vpop.permute.xlu0 %423  ;;  %v350_v3 = vadd.f32 %v346_v60, %v284_v57  ;;  %v513_v28 = vrot.slane %v505_v15, %v958_v54  ;;  %v570_v38 = vsel %vm85_vm4, 1, %v858_v55  ;;  %v561_v59 = vstv %s1131_s12 }
  0xd8   :  { %v396_v5 = vrot.slane %v389_v62, %v922_v26  ;;  %v427_v6 = vsel %vm420_vm3, %v424_v2, %v426_v0  ;;  %v428_v7 = vsel %vm420_vm3, %v426_v0, %v424_v2  ;;  %vm1154_vm8 = vcmp.eq.s32.totalorder %v509_v27, 1 }
  0xd9   :  { %v435_v11 = vmul.f32 %v434_v39, %v427_v6  ;;  %v436_v12 = vmul.f32 %v434_v39, %v428_v7  ;;  %vm1158_vm9 = vcmp.eq.s32.totalorder %v513_v28, 1  ;;  %v574_v60 = vrot.slane %v570_v38, %v947_v52 }
  0xda   :  { %v397_v13 = vcombine.high %v396_v5, %v396_v5  ;;  %v404_v14 = vrot.slane %v396_v5, %v922_v26  ;;  %v565_v63 = vstv %s1139_s13  ;;  %v578_v0 = vrot.slane %v570_v38, %v958_v54 }
  0xdb   :  { %v437_v16 = vadd.f32 %v435_v11, %v431_v8  ;;  %v438_v17 = vadd.f32 %v436_v12, %v432_v9  ;;  %v484_v18 = vpop.permute.xlu1 %483  ;;  %v482_v19 = vpop.permute.xlu0 %481  ;;  %vm1185_vm12 = vcmp.eq.s32.totalorder %v574_v60, 1  ;;  %vm692_vm0 = vcmp.lt.s32.totalorder %v104_v4, 256 }
  0xdc   :  { %v411_v21 = vrot.slane %v397_v13, %v922_v26  ;;  %v414_v20 = vadd.f32 %v404_v14, %v349_v61  ;;  %v486_v31 = vsel %vm485_vm1, %v482_v19, %v484_v18  ;;  %v487_v32 = vsel %vm485_vm1, %v484_v18, %v482_v19 }
  0xdd   :  { %v450_v24 = vsel %vm1108_vm5, %v437_v16, 0.0  ;;  %v451_v25 = vsel %vm1122_vm7, %v438_v17, 0.0  ;;  %v496_v39 = vmul.f32 %v495_v22, %v486_v31  ;;  %v497_v40 = vmul.f32 %v495_v22, %v487_v32 }
  0xde   :  { %v415_v29 = vadd.f32 %v411_v21, %v350_v3  ;;  %v454_v30 = vcombine.low %v450_v24, %v451_v25  ;;  %vm1194_vm2 = vcmp.eq.s32.totalorder %v578_v0, 1  ;;  %v636_v17 = vsel %vm635_vm11, 1, %v858_v55 }
  0xdf   :  { %v491_v34 = vpop.permute.xlu1 %490  ;;  %v489_v35 = vpop.permute.xlu0 %488  ;;  %v626_v24 = vstv %s1166_s14  ;;  %v630_v25 = vstv %s1168_s15  ;;  %v644_v55 = vrot.slane %v636_v17, %v958_v54 }
  0xe0   :  { %v461_v36 = vrot.slane %v454_v30, %v922_v26  ;;  %v492_v37 = vsel %vm485_vm1, %v489_v35, %v491_v34  ;;  %v493_v33 = vsel %vm485_vm1, %v491_v34, %v489_v35 }
  0xe1   :  { %v500_v41 = vmul.f32 %v499_v23, %v492_v37  ;;  %v501_v42 = vmul.f32 %v499_v23, %v493_v33  ;;  %vm646_vm15 = vcmp.eq.s32.totalorder %v644_v55, 1 }
  0xe2   :  { %v462_v43 = vcombine.high %v461_v36, %v461_v36  ;;  %v469_v48 = vrot.slane %v461_v36, %v922_v26 }
  0xe3   :  { %v502_v51 = vadd.f32 %v500_v41, %v496_v39  ;;  %v503_v56 = vadd.f32 %v501_v42, %v497_v40  ;;  %v550_v45 = vpop.permute.xlu1 %549  ;;  %v548_v57 = vpop.permute.xlu0 %547 }
  0xe4   :  { %v476_v44 = vrot.slane %v462_v43, %v922_v26  ;;  %v479_v58 = vadd.f32 %v469_v48, %v414_v20  ;;  %v552_v3 = vsel %vm551_vm10, %v548_v57, %v550_v45  ;;  %v553_v5 = vsel %vm551_vm10, %v550_v45, %v548_v57 }
  0xe5   :  { %v516_v61 = vsel %vm1154_vm8, %v502_v51, 0.0  ;;  %v517_v62 = vsel %vm1158_vm9, %v503_v56, 0.0  ;;  %v562_v13 = vmul.f32 %v561_v59, %v552_v3  ;;  %v563_v14 = vmul.f32 %v561_v59, %v553_v5 }
  0xe6   :  { %v480_v1 = vadd.f32 %v476_v44, %v415_v29  ;;  %v520_v2 = vcombine.low %v516_v61, %v517_v62  ;;  %v640_v29 = vrot.slane %v636_v17, %v947_v52 }
  0xe7   :  { %v557_v6 = vpop.permute.xlu1 %556  ;;  %v555_v7 = vpop.permute.xlu0 %554 }
  0xe8   :  { %v527_v8 = vrot.slane %v520_v2, %v922_v26  ;;  %v558_v11 = vsel %vm551_vm10, %v555_v7, %v557_v6  ;;  %v559_v12 = vsel %vm551_vm10, %v557_v6, %v555_v7  ;;  %vm645_vm14 = vcmp.eq.s32.totalorder %v640_v29, 1 }
  0xe9   :  { %v566_v47 = vmul.f32 %v565_v63, %v558_v11  ;;  %v567_v10 = vmul.f32 %v565_v63, %v559_v12 }
  0xea   :  { %v528_v46 = vcombine.high %v527_v8, %v527_v8  ;;  %v535_v15 = vrot.slane %v527_v8, %v922_v26 }
  0xeb   :  { %v568_v18 = vadd.f32 %v566_v47, %v562_v13  ;;  %v569_v19 = vadd.f32 %v567_v10, %v563_v14  ;;  %v615_v21 = vpop.permute.xlu1 %614  ;;  %v613_v20 = vpop.permute.xlu0 %612 }
  0xec   :  { %v542_v22 = vrot.slane %v528_v46, %v922_v26  ;;  %v545_v23 = vadd.f32 %v535_v15, %v479_v58  ;;  %v617_v32 = vsel %vm616_vm13, %v613_v20, %v615_v21  ;;  %v618_v34 = vsel %vm616_vm13, %v615_v21, %v613_v20 }
  0xed   :  { %v581_v27 = vsel %vm1185_vm12, %v568_v18, 0.0  ;;  %v582_v28 = vsel %vm1194_vm2, %v569_v19, 0.0  ;;  %v627_v38 = vmul.f32 %v626_v24, %v617_v32  ;;  %v628_v54 = vmul.f32 %v626_v24, %v618_v34 }
  0xee   :  { %v546_v30 = vadd.f32 %v542_v22, %v480_v1  ;;  %v585_v31 = vcombine.low %v581_v27, %v582_v28 }
  0xef   :  { %v622_v35 = vpop.permute.xlu1 %621  ;;  %v620_v36 = vpop.permute.xlu0 %619 }
  0xf0   :  { %v592_v37 = vrot.slane %v585_v31, %v922_v26  ;;  %v623_v33 = vsel %vm616_vm13, %v620_v36, %v622_v35  ;;  %v624_v52 = vsel %vm616_vm13, %v622_v35, %v620_v36 }
  0xf1   :  { %v631_v39 = vmul.f32 %v630_v25, %v623_v33  ;;  %v632_v40 = vmul.f32 %v630_v25, %v624_v52 }
  0xf2   :  { %v593_v41 = vcombine.high %v592_v37, %v592_v37  ;;  %v600_v42 = vrot.slane %v592_v37, %v922_v26 }
  0xf3   :  { %v633_v43 = vadd.f32 %v631_v39, %v627_v38  ;;  %v634_v48 = vadd.f32 %v632_v40, %v628_v54 }
  0xf4   :  { %v607_v49 = vrot.slane %v593_v41, %v922_v26  ;;  %v610_v50 = vadd.f32 %v600_v42, %v545_v23 }
  0xf5   :  { %v647_v51 = vsel %vm645_vm14, %v633_v43, 0.0  ;;  %v648_v56 = vsel %vm646_vm15, %v634_v48, 0.0 }
  0xf6   :  { %v611_v45 = vadd.f32 %v607_v49, %v546_v30  ;;  %v651_v57 = vcombine.low %v647_v51, %v648_v56 }
  0xf8   :  { %v658_v53 = vrot.slane %v651_v57, %v922_v26 }
  0xfa   :  { %v659_v44 = vcombine.high %v658_v53, %v658_v53  ;;  %v666_v58 = vrot.slane %v658_v53, %v922_v26 }
  0xfc   :  { %v673_v59 = vrot.slane %v659_v44, %v922_v26  ;;  %v676_v60 = vadd.f32 %v666_v58, %v610_v50 }
  0xfe   :  { %v677_v61 = vadd.f32 %v673_v59, %v611_v45  ;;  %v732_v62 = vmul.f32 -1.442695, %v676_v60 }
 0x100   :  { %752 = vpow2.f32 %v732_v62  ;;  %v733_v63 = vmul.f32 -1.442695, %v677_v61 }
 0x102   :  { %754 = vpow2.f32 %v733_v63 }
 0x10a   :  { %v753_v0 = vpop.eup %752 }
 0x10b   :  { %v684_v1 = vadd.f32 1.0, %v753_v0 }
 0x10c   :  { %v755_v2 = vpop.eup %754 }
 0x10d   :  { %v685_v3 = vadd.f32 1.0, %v755_v2  ;;  %756 = vrcp.f32 %v684_v1 }
 0x10f   :  { %758 = vrcp.f32 %v685_v3 }
 0x117   :  { %v757_v5 = vpop.eup %756 }
 0x118   :  { %694 = vst.msk [vmem:[#allocation9] sm:$0x3] %vm692_vm0, %v757_v5 }
 0x119   :  { %v759_v26 = vpop.eup %758 }
 0x11a   :  { %695 = vst.msk [vmem:[#allocation9 + $0x2] sm:$0x3] %vm692_vm0, %v759_v26 }
 0x11b   :  { %825 = shalt.err (!%p822_p9)
}
 0x11c   :  { %s826_s19 = scalar_lea.hbm %s1239_s3, 64 }
 0x11d   :  { %p827_p10 = scmp.ne.s32.totalorder %s1239_s3, %s826_s19  ;;  %p830_p11 = scmp.lt.u32.totalorder %s826_s19, %s1239_s3 }
 0x11f   :  { %p832_p12 = pnand %p830_p11, %p827_p10 }
 0x121   :  { %835 = shalt.err (!%p832_p12)
}
 0x122   :  { %s860_s24 = smov 32   ;;  %s861_s25 = smov 2  }
 0x123   :  { %707 = dma.vmem_to_hbm [thread:$0]  %s702_s16, 64, %s1239_s3, [#allocation4], %s860_s24, %s860_s24, %s861_s25  }
 0x124   :  { %842 = dma.done.wait [#allocation4], 64  }
 0x125   :  { %843 = vsyncadd [#allocation4], 4294967232 }
 0x126   :  { %711 = vsyncpa [#allocation3], 1 }
 0x127   :  { %712 = vsyncpa [#allocation8], 1 }
 0x128   :  { %713 = vsyncpa [#allocation4], 1 }
 0x129   :  { %714 = vsyncpa [#allocation5], 1 }

</bundles_post_ra>
